<compile_context>
chip_gen: v5e
topology: v5e:2x2
jax: 0.10.0
libtpu: 0.0.40
codegen_flags: <defaults>
</compile_context>

<pallas_src>
import functools
import math

import jax
import jax.numpy as jnp
from jax import lax
from jax.experimental import pallas as pl
from jax.experimental.pallas import tpu as pltpu


def _round_up(x, m):
    return ((x + m - 1) // m) * m


# ---------------------------------------------------------------------------
# Pallas kernel: one image per grid step.
#   x_ref : (1, Co, Lp)        zero-dilated, padded input, flat spatial (lane)
#   w_ref : (K*K*Ci, Co)       flipped weights, rows ordered (kh, kw, ci)
#   o_ref : (1, Ci, Lo)        "wide" output (width Wp per row), flat spatial
# ---------------------------------------------------------------------------
def _tconv_kernel(x_ref, w_ref, o_ref, *, K, Wp, Ci, Lo):
    x = x_ref[0]                                    # (Co, Lp)
    w = w_ref[...]                                  # (K*K*Ci, Co)

    # Single MXU matmul: channel contraction for all K*K taps at full width.
    p_all = jnp.dot(w, x, preferred_element_type=jnp.float32)   # (K*K*Ci, Lp)

    # Tap reduction = static shift-and-add of lane slices (unrolled, LLO-visible).
    acc = p_all[0:Ci, 0:Lo]                         # tap (kh=0, kw=0), shift 0
    for kk in range(1, K * K):
        kh, kw = divmod(kk, K)
        d = kh * Wp + kw
        acc = acc + p_all[kk * Ci:(kk + 1) * Ci, d:d + Lo]

    o_ref[0] = acc.astype(o_ref.dtype)


def _tconv_pallas(xf, w_mat, *, K, Wp, Ci, Lo, out_dtype):
    N, Co, Lp = xf.shape
    KKCi, _ = w_mat.shape
    kernel = functools.partial(_tconv_kernel, K=K, Wp=Wp, Ci=Ci, Lo=Lo)
    return pl.pallas_call(
        kernel,
        out_shape=jax.ShapeDtypeStruct((N, Ci, Lo), out_dtype),
        grid=(N,),
        in_specs=[
            # per-image input slab, double-buffered across the batch grid
            pl.BlockSpec((1, Co, Lp), lambda n: (n, 0, 0)),
            # tiny weights, constant block index -> fetched once, VMEM-resident
            pl.BlockSpec((KKCi, Co), lambda n: (0, 0)),
        ],
        out_specs=pl.BlockSpec((1, Ci, Lo), lambda n: (n, 0, 0)),
        compiler_params=pltpu.CompilerParams(
            dimension_semantics=("parallel",),      # megacore split over batch (v7x)
            vmem_limit_bytes=32 * 1024 * 1024,      # explicit; safe on v5e/v6e/v7x
        ),
    )(xf, w_mat)


class AffineTransposeConv2d:
    """JAX/Pallas port of convex_adversarial.affine.AffineTransposeConv2d."""

    def __init__(self, weight, stride, padding):
        # weight: [Co, Ci, K, K]  (PyTorch Conv2d weight, shared by the
        # ConvTranspose2d: its in_channels = Co, out_channels = Ci)
        self.weight = weight
        self.stride = int(stride)
        self.padding = int(padding)

    def __call__(self, x):
        Co, Ci, K, _ = self.weight.shape
        s, p = self.stride, self.padding
        pd = K - 1 - p
        if pd < 0:
            # TODO(synk): support padding > kernel_size-1 (needs output crop)
            raise NotImplementedError(
                "AffineTransposeConv2d Pallas port requires padding <= kernel_size - 1")

        if x.ndim == 1:
            x = x[None, :]
        if x.ndim == 2:
            # convert2to4: in_channels of the ConvTranspose2d == Co (exact isqrt)
            m, n = x.shape
            k = math.isqrt(n // Co)
            x = x.reshape(m, Co, k, k)

        N, _, Hi, Wi = x.shape
        Hd, Wd = (Hi - 1) * s + 1, (Wi - 1) * s + 1          # dilated size
        Hp, Wp = Hd + 2 * pd, Wd + 2 * pd                    # padded size
        Ho, Wo = Hp - K + 1, Wp - K + 1                      # == (Hi-1)s - 2p + K

        # lane-aligned flat lengths (output kept at "wide" row width Wp)
        Lo = _round_up(Ho * Wp, 128)
        Lp = _round_up(max(Hp * Wp, (K - 1) * (Wp + 1) + Lo), 128)

        # --- glue (all NCHW, no transposes): zero-dilate, pad, flatten, lane-pad ---
        xd = jnp.zeros((N, Co, Hd, Wd), x.dtype).at[:, :, ::s, ::s].set(x)
        xp = jnp.pad(xd, ((0, 0), (0, 0), (pd, pd), (pd, pd)))
        xf = jnp.pad(xp.reshape(N, Co, Hp * Wp),
                     ((0, 0), (0, 0), (0, Lp - Hp * Wp)))

        # flipped kernel arranged as Wmat[(kh, kw, ci), co]
        w_flip = self.weight[:, :, ::-1, ::-1]               # [Co, Ci, K, K]
        w_mat = jnp.transpose(w_flip, (2, 3, 1, 0)).reshape(K * K * Ci, Co)

        # --- hot path: Pallas kernel ---
        out_wide = _tconv_pallas(xf, w_mat, K=K, Wp=Wp, Ci=Ci, Lo=Lo,
                                 out_dtype=x.dtype)          # (N, Ci, Lo)

        # crop the wide rows (width Wp -> Wo); output is already NCHW-ordered
        out = out_wide[:, :, :Ho * Wp].reshape(N, Ci, Ho, Wp)[:, :, :, :Wo]
        return out.reshape(N, -1)                            # convert4to2


def _reference(x_nchw, weight, stride, padding):
    """Pure-XLA transposed conv (gradient-of-conv semantics, like PyTorch)."""
    Co, Ci, K, _ = weight.shape
    p = padding
    w_conv = jnp.transpose(weight[:, :, ::-1, ::-1], (1, 0, 2, 3))  # [Ci, Co, K, K]
    y = lax.conv_general_dilated(
        x_nchw, w_conv,
        window_strides=(1, 1),
        padding=[(K - 1 - p, K - 1 - p)] * 2,
        lhs_dilation=(stride, stride),
        dimension_numbers=("NCHW", "OIHW", "NCHW"),
    )
    return y.reshape(y.shape[0], -1)


if __name__ == "__main__":
    key = jax.random.PRNGKey(0)
    k_w, k_x = jax.random.split(key)

    # original: nn.Conv2d(in_channels=4, out_channels=8, kernel_size=3, stride=2, padding=1)
    Ci, Co, K, stride, padding = 4, 8, 3, 2, 1
    bound = 1.0 / math.sqrt(Ci * K * K)        # deterministic PyTorch-style init
    weight = jax.random.uniform(k_w, (Co, Ci, K, K), jnp.float32, -bound, bound)

    layer = AffineTransposeConv2d(weight, stride, padding)

    # x lives in the *output* space of the original conv: [N, Co, Hi, Wi]
    N, Hi, Wi = 2, 16, 16
    x4 = jax.random.normal(k_x, (N, Co, Hi, Wi), jnp.float32)

    y4 = jax.block_until_ready(layer(x4))                    # 4-D input path
    y2 = jax.block_until_ready(layer(x4.reshape(N, -1)))     # 2-D input path

    Ho = (Hi - 1) * stride - 2 * padding + K
    ref = _reference(x4, weight, stride, padding)
    assert y4.shape == (N, Ci * Ho * Ho) and ref.shape == y4.shape
    assert jnp.allclose(y4, ref, atol=1e-4, rtol=1e-4)
    assert jnp.allclose(y2, ref, atol=1e-4, rtol=1e-4)
    print("KERNEL_OK")
</pallas_src>

<mosaic_0001>
module attributes {stable_mosaic.version = 11 : i64} {
  func.func @_tconv_kernel(%arg0: i32, %arg1: memref<1x8x1152xf32, #tpu.memory_space<vmem>>, %arg2: memref<36x8xf32, #tpu.memory_space<vmem>>, %arg3: memref<1x4x1024xf32, #tpu.memory_space<vmem>>) attributes {dimension_semantics = [#tpu.dimension_semantics<parallel>], iteration_bounds = array<i64: 2>, scalar_prefetch = 0 : i64, scratch_operands = 0 : i64, tpu.core_type = #tpu.core_type<tc>, window_params = [{transform_indices = @transform_0, window_bounds = array<i64: 1, 8, 1152>}, {pipeline_mode = #tpu.pipeline_mode<synchronous>, transform_indices = @transform_1, window_bounds = array<i64: 36, 8>}, {transform_indices = @transform_2, window_bounds = array<i64: 1, 4, 1024>}]} {
    %c0 = arith.constant 0 : index
    %c0_0 = arith.constant 0 : index
    %c0_1 = arith.constant 0 : index
    %0 = vector.load %arg1[%c0, %c0_0, %c0_1] : memref<1x8x1152xf32, #tpu.memory_space<vmem>>, vector<1x8x1152xf32>
    %1 = vector.shape_cast %0 : vector<1x8x1152xf32> to vector<8x1152xf32>
    %c0_2 = arith.constant 0 : index
    %c0_3 = arith.constant 0 : index
    %2 = vector.load %arg2[%c0_2, %c0_3] : memref<36x8xf32, #tpu.memory_space<vmem>>, vector<36x8xf32>
    %cst = arith.constant dense<0.000000e+00> : vector<36x1152xf32>
    %3 = tpu.matmul %2, %1, %cst {dimension_numbers = #tpu.dot_dimension_numbers<[1], [0], [0], [1], [0, 0, 1, 1], [], []>} : vector<36x8xf32>, vector<8x1152xf32>, vector<36x1152xf32> -> vector<36x1152xf32>
    %4 = vector.extract_strided_slice %3 {offsets = [0, 0], sizes = [4, 1024], strides = [1, 1]} : vector<36x1152xf32> to vector<4x1024xf32>
    %5 = vector.extract_strided_slice %3 {offsets = [4, 1], sizes = [4, 1024], strides = [1, 1]} : vector<36x1152xf32> to vector<4x1024xf32>
    %6 = arith.addf %4, %5 : vector<4x1024xf32>
    %7 = vector.extract_strided_slice %3 {offsets = [8, 2], sizes = [4, 1024], strides = [1, 1]} : vector<36x1152xf32> to vector<4x1024xf32>
    %8 = arith.addf %6, %7 : vector<4x1024xf32>
    %9 = vector.extract_strided_slice %3 {offsets = [12, 33], sizes = [4, 1024], strides = [1, 1]} : vector<36x1152xf32> to vector<4x1024xf32>
    %10 = arith.addf %8, %9 : vector<4x1024xf32>
    %11 = vector.extract_strided_slice %3 {offsets = [16, 34], sizes = [4, 1024], strides = [1, 1]} : vector<36x1152xf32> to vector<4x1024xf32>
    %12 = arith.addf %10, %11 : vector<4x1024xf32>
    %13 = vector.extract_strided_slice %3 {offsets = [20, 35], sizes = [4, 1024], strides = [1, 1]} : vector<36x1152xf32> to vector<4x1024xf32>
    %14 = arith.addf %12, %13 : vector<4x1024xf32>
    %15 = vector.extract_strided_slice %3 {offsets = [24, 66], sizes = [4, 1024], strides = [1, 1]} : vector<36x1152xf32> to vector<4x1024xf32>
    %16 = arith.addf %14, %15 : vector<4x1024xf32>
    %17 = vector.extract_strided_slice %3 {offsets = [28, 67], sizes = [4, 1024], strides = [1, 1]} : vector<36x1152xf32> to vector<4x1024xf32>
    %18 = arith.addf %16, %17 : vector<4x1024xf32>
    %19 = vector.extract_strided_slice %3 {offsets = [32, 68], sizes = [4, 1024], strides = [1, 1]} : vector<36x1152xf32> to vector<4x1024xf32>
    %20 = arith.addf %18, %19 : vector<4x1024xf32>
    %c0_4 = arith.constant 0 : index
    %c0_5 = arith.constant 0 : index
    %c0_6 = arith.constant 0 : index
    %21 = vector.load %arg3[%c0_4, %c0_5, %c0_6] : memref<1x4x1024xf32, #tpu.memory_space<vmem>>, vector<1x4x1024xf32>
    %22 = vector.shape_cast %21 : vector<1x4x1024xf32> to vector<4x1024xf32>
    %23 = vector.shape_cast %20 : vector<4x1024xf32> to vector<1x4x1024xf32>
    tpu.vector_store %arg3[%c0_4, %c0_5, %c0_6], %23 {strides = array<i32>} : memref<1x4x1024xf32, #tpu.memory_space<vmem>>, vector<1x4x1024xf32>,
    return
  }
  func.func @transform_0(%arg0: i32) -> (i32, i32, i32) {
    %c0_i32 = arith.constant 0 : i32
    %c0_i32_0 = arith.constant 0 : i32
    %c0_i32_1 = arith.constant 0 : i32
    return %arg0, %c0_i32, %c0_i32_0 : i32, i32, i32
  }
  func.func @transform_1(%arg0: i32) -> (i32, i32) {
    %c0_i32 = arith.constant 0 : i32
    %c0_i32_0 = arith.constant 0 : i32
    %c0_i32_1 = arith.constant 0 : i32
    return %c0_i32, %c0_i32_0 : i32, i32
  }
  func.func @transform_2(%arg0: i32) -> (i32, i32, i32) {
    %c0_i32 = arith.constant 0 : i32
    %c0_i32_0 = arith.constant 0 : i32
    %c0_i32_1 = arith.constant 0 : i32
    return %arg0, %c0_i32, %c0_i32_0 : i32, i32, i32
  }
}

</mosaic_0001>

<bundles_post_ra>
// kernel: tpu_custom_call.1
= control target key start
LH: loop header
LB: loop body
LE: loop exit
PB: predicated region body
PF: predicated region fallthrough
CT: control target
= control target key end

     0   :  { %7 = vsyncpa [#allocation3], 0  ;;  %s1734_s0 = inlined_call_operand.hbm [shape: f32[2,8,1152], index: 0, kind: input, shape index: {}]   ;;  %s1735_s1 = inlined_call_operand.vmem [shape: f32[36,8], index: 1, kind: input, shape index: {}]   ;;  %s1736_s2 = inlined_call_operand.hbm [shape: f32[2,4,1024], index: 2, kind: output, shape index: {}]  }
   0x1   :  { %9 = vsyncpa [#allocation3 + $0x1], 0 }
   0x2   :  { %10 = vsyncpa [#allocation4], 0 }
   0x3   :  { %12 = vsyncpa [#allocation4 + $0x1], 0  ;;  %s1255_s9 = smov 0   ;;  %s1257_s10 = smov 0  }
   0x4   :  { %s1259_s11 = smov 0   ;;  %s1261_s12 = smov 0  }
   0x5 LB: > { %s1276_s13 = sadd.s32 4294967295, %s1230_s12   ;;  %s1017_s14 = sadd.s32 4294967294, %s1230_s12   ;;  %s1230_s12 = sphi %s1261_s12, %s1744_s12   ;;  %s1226_s11 = sphi %s1259_s11, %s1743_s11   ;;  %s1222_s10 = sphi %s1257_s10, %s1742_s10   ;;  %s1218_s9 = sphi %s1255_s9, %s1741_s9  }
   0x6   : > { %s1280_s15 = sadd.s32 1, %s1230_s12   ;;  %s25_s16 = sadd.s32 1, %s1226_s11 }
   0x7   : > { %s22_s17 = ssub.s32 %s1230_s12, %s1280_s15  ;;  %p32_p0 = scmp.ne.s32.totalorder %s1226_s11, %s1222_s10 }
   0x8   : > { %p23_p1 = scmp.eq.s32.totalorder %s22_s17, 0  ;;  %p33_p2 = scmp.eq.s32.totalorder %s1230_s12, 0 }
   0x9   : > { %p38_p3 = scmp.ne.s32.totalorder %s1222_s10, %s1218_s9  ;;  %p39_p4 = scmp.eq.s32.totalorder %s1276_s13, 0 }
   0xa   : > { %s1292_s18 = scalar_select %p23_p1, %s1226_s11, %s25_s16  }
   0xb   : > { %p34_p5 = por %p33_p2, %p32_p0  ;;  %p1294_p6 = por %p39_p4, %p38_p3 }
   0xc   : > { %p83_p7 = scmp.eq.s32.totalorder %s1276_s13, 1  ;;  %p89_p8 = scmp.eq.s32.totalorder %s1017_s14, 1 }
   0xd   : > { %p1019_p9 = scmp.ge.s32.totalorder %s1230_s12, 2  ;;  %p1092_p10 = scmp.lt.s32.totalorder %s1230_s12, 2 }
   0xe   : > { %p1301_p11 = por %p83_p7, %p32_p0  ;;  %p1305_p12 = por %p89_p8, %p38_p3 }
   0xf   : > { %s112_s22 = sand.u32 1, %s1226_s11   ;;  %s1078_s23 = smul.u32 72, %s1230_s12 }
  0x10   : > { %s1077_s24 = smul.u32 72, %s112_s22  ;;  %p1314_p13 = pnand %p1092_p10, %p34_p5 }
  0x11   : > { %s121_s27 = scalar_lea.hbm %s1734_s0, %s1078_s23  ;;  %s113_s4 = scalar_lea.sflag [#allocation3], %s112_s22 }
  0x12   : > { %s123_s29 = sshll.u32 %s121_s27, 4  ;;  %s116_s30 = scalar_lea.vmem [#allocation2], %s1077_s24  ;;  %s124_s29 = int_to_ptr.hbm [resolvable:$true] %s123_s29 }
  0x13   : > { %s125_s3 = sshll.u32 %s116_s30, 4  ;;  %s1134_s5 = sshra.s32 %s124_s29, 4  ;;  %s126_s3 = int_to_ptr.vmem [resolvable:$true] %s125_s3  ;;  %s1135_s5 = int_to_ptr.hbm [resolvable:$true] %s1134_s5 }
  0x14   : > { %s1136_s6 = scalar_lea.hbm %s1135_s5, 72  ;;  %p1138_p1 = pneg %p1314_p13 }
  0x15   : > { %p1137_p0 = scmp.ne.s32.totalorder %s1135_s5, %s1136_s6  ;;  %s1141_s14 = scalar_lea.hbm %s1734_s0, 144 }
  0x16   : > { %p1142_p4 = scmp.lt.s32.totalorder %s1135_s5, %s1734_s0  ;;  %p1143_p5 = scmp.lt.s32.totalorder %s1141_s14, %s1136_s6 }
  0x17   : > { %p1139_p2 = pnand %p1138_p1, %p1137_p0 }
  0x18   : > { %p1144_p7 = por %p1143_p5, %p1142_p4 }
  0x19   : > { %p1140_p3 = pneg %p1139_p2 }
  0x1b   : > { %p1145_p8 = pnand %p1144_p7, %p1140_p3 }
  0x1d   : > { %1148 = shalt.err (!%p1145_p8)
}
  0x1e   : > { %1087 = dma.hbm_to_vmem [thread:$0]  (!%p1314_p13), %s124_s29, 1152, %s126_s3, %s113_s4  }
  0x1f   : > { %p1021_p10 = scmp.ge.s32.totalorder %s1230_s12, 1  ;;  %p130_p0 = scmp.lt.s32.totalorder %s1230_s12, 3 }
  0x21   : > { %p131_p1 = pnand %p1021_p10, %p130_p0 }
  0x22   : > { %s1331_s22 = sand.u32 (!%p131_p1), 1, %s1222_s10  }
  0x23   : > { %134 = sbr.rel (%p131_p1) target bundleno = 494 (0x1ee), region = 28  ;;  %s137_s24 = scalar_lea.sflag (!%p131_p1), [#allocation3], %s1331_s22 }
  0x24   : > { %s1079_s23 = smul.u32 (!%p131_p1), 72, %s1331_s22 }
  0x26   : > { %s1335_s25 = scalar_lea.vmem (!%p131_p1), [#allocation2], %s1079_s23 }
  0x28   : > { %1209 = dma.done.wait (%p1294_p6), %s137_s24, 1152  }
  0x29   : > { %1211 = vsyncadd (%p1294_p6), %s137_s24, 4294966144  ;;  %vm176_vm0 = vcmask 64512   ;;  %v162_v0 = vld [vmem:[%s1335_s25] sm:$0xff]  ;;  %v173_v2 = vld [vmem:[%s1735_s1 + $0x10] sm:$0xff]  ;;  %s1232_s7 = smov 126   ;;  %s1233_s8 = smov 127  }
  0x2a   : > { %v172_v1 = vld [vmem:[%s1735_s1 + $0x8] sm:$0xff]  ;;  %1074 = vmatpush.msra.mxu1 %v162_v0  ;;  %1075 = vmatpush.msra.mxu2 %v162_v0  ;;  %v1351_v3 = vld [vmem:[%s1735_s1 + $0x20] sm:$0xf]  ;;  %v164_v7 = vld [vmem:[%s1335_s25 + $0x10] sm:$0xff]  ;;  %s1234_s14 = smov 95   ;;  %s1235_s16 = smov 94  }
  0x2b   : > { %v165_v4 = vld [vmem:[%s1335_s25 + $0x18] sm:$0xff]  ;;  %1076 = vmatpush.msra.mxu3 %v162_v0  ;;  %1024 = vmatmul.msk.f32.vlgmr.msra.gmra.mxu1 %vm176_vm0, %v172_v1  ;;  %v163_v6 = vld [vmem:[%s1335_s25 + $0x8] sm:$0xff]  ;;  %v166_v8 = vld [vmem:[%s1335_s25 + $0x20] sm:$0xff]  ;;  %s1236_s17 = smov 93   ;;  %s1237_s23 = smov 62   ;;  %vm516_vm1 = vcmask 1039360  }
  0x2c   : > { %v171_v5 = vld [vmem:[%s1735_s1] sm:$0xff]  ;;  %1025 = vmatmul.msk.f32.vlgmr.msra.gmra.mxu2 %vm176_vm0, %v173_v2  ;;  %1027 = vmatmul.msk.f32.vlgmr.msra.gmra.mxu3 %vm176_vm0, %v1351_v3  ;;  %v174_v9 = vld [vmem:[%s1735_s1 + $0x18] sm:$0xff]  ;;  %v167_v10 = vld [vmem:[%s1335_s25 + $0x28] sm:$0xff]  ;;  %s1238_s24 = smov 61   ;;  %vm568_vm2 = vcmask 1031168   ;;  %vm620_vm3 = vcmask 777216  }
  0x2d   : > { %303 = vmatpush.msrb.mxu3 %v165_v4  ;;  %207 = vmatpush.msra.mxu0 %v162_v0  ;;  %v170_v11 = vld [vmem:[%s1335_s25 + $0x40] sm:$0xff]  ;;  %v169_v12 = vld [vmem:[%s1335_s25 + $0x38] sm:$0xff]  ;;  %v168_v13 = vld [vmem:[%s1335_s25 + $0x30] sm:$0xff]  ;;  %s1239_s25 = smov 60   ;;  %vm672_vm4 = vcmask 769024   ;;  %vm724_vm5 = vcmask 760832  }
  0x2e   : > { %1023 = vmatmul.msk.f32.vlgmr.msra.gmra.mxu0 %vm176_vm0, %v171_v5  ;;  %239 = vmatpush.msrb.mxu1 %v163_v6  ;;  %vm776_vm6 = vcmask 506880   ;;  %vm828_vm7 = vcmask 498688   ;;  %vm880_vm8 = vcmask 490496   ;;  %s1022_s26 = sshll.u32 %s1331_s22, 5  ;;  %vm917_vm9 = vcmask 1043456   ;;  %s1073_s28 = sshll.u32 %s1276_s13, 5 }
  0x2f   : > { %271 = vmatpush.msrb.mxu2 %v164_v7  ;;  %335 = vmatpush.msrb.mxu0 %v166_v8  ;;  %s1645_s27 = scalar_lea.vmem [#allocation5], %s1022_s26  ;;  %s942_s19 = scalar_lea.hbm %s1736_s2, %s1073_s28 }
  0x30   : > { %367 = vmatpush.msra.mxu1 %v167_v10  ;;  %431 = vmatpush.msra.mxu3 %v169_v12  ;;  %s944_s13 = sshll.u32 %s1645_s27, 4  ;;  %s946_s3 = sshll.u32 %s942_s19, 4  ;;  %s945_s13 = int_to_ptr.vmem [resolvable:$true] %s944_s13  ;;  %s947_s3 = int_to_ptr.hbm [resolvable:$true] %s946_s3 }
  0x31   : > { %463 = vmatpush.msra.mxu0 %v170_v11  ;;  %399 = vmatpush.msra.mxu2 %v168_v13  ;;  %s931_s4 = scalar_lea.sflag [#allocation4], %s1331_s22  ;;  %s1178_s5 = sshra.s32 %s947_s3, 4  ;;  %s1179_s5 = int_to_ptr.hbm [resolvable:$true] %s1178_s5 }
  0x32   : > { %s1180_s6 = scalar_lea.hbm %s1179_s5, 32  ;;  %p1185_p3 = scmp.lt.s32.totalorder %s1179_s5, %s1736_s2 }
  0x33   : > { %1028 = vmatmul.msk.f32.vlgmr.msrb.gmra.mxu1 %vm176_vm0, %v171_v5  ;;  %p1181_p6 = scmp.ne.s32.totalorder %s1179_s5, %s1180_s6 }
  0x34   : > { %1026 = vmatmul.msk.f32.gmra.mxu2 %vm176_vm0, %v174_v9  ;;  %1038 = vmatmul.msk.f32.vlgmr.msrb.gmra.mxu3 %vm176_vm0, %v171_v5 }
  0x35   : > { %p1182_p13 = pnand %p1181_p6, %p1301_p11 }
  0x36   : > { %1043 = vmatmul.msk.f32.vlgmr.msrb.gmra.mxu0 %vm176_vm0, %v171_v5 }
  0x37   : > { %p1183_p2 = pneg %p1182_p13 }
  0x3b   : > { %1029 = vmatmul.msk.f32.gmra.mxu1 %vm176_vm0, %v172_v1 }
  0x3c   : > { %1033 = vmatmul.msk.f32.vlgmr.msrb.gmra.mxu2 %vm176_vm0, %v171_v5  ;;  %1039 = vmatmul.msk.f32.gmra.mxu3 %vm176_vm0, %v172_v1 }
  0x3e   : > { %1044 = vmatmul.msk.f32.gmra.mxu0 %vm176_vm0, %v172_v1 }
  0x43   : > { %1030 = vmatmul.msk.f32.gmra.mxu1 %vm176_vm0, %v173_v2 }
  0x44   : > { %1034 = vmatmul.msk.f32.gmra.mxu2 %vm176_vm0, %v172_v1  ;;  %1040 = vmatmul.msk.f32.gmra.mxu3 %vm176_vm0, %v173_v2 }
  0x46   : > { %1045 = vmatmul.msk.f32.gmra.mxu0 %vm176_vm0, %v173_v2 }
  0x4b   : > { %1031 = vmatmul.msk.f32.gmra.mxu1 %vm176_vm0, %v174_v9 }
  0x4c   : > { %1035 = vmatmul.msk.f32.gmra.mxu2 %vm176_vm0, %v173_v2  ;;  %1041 = vmatmul.msk.f32.gmra.mxu3 %vm176_vm0, %v174_v9 }
  0x4e   : > { %1046 = vmatmul.msk.f32.gmra.mxu0 %vm176_vm0, %v174_v9 }
  0x53   : > { %1032 = vmatmul.msk.f32.gmra.mxu1 %vm176_vm0, %v1351_v3 }
  0x54   : > { %1036 = vmatmul.msk.f32.gmra.mxu2 %vm176_vm0, %v174_v9  ;;  %1042 = vmatmul.msk.f32.gmra.mxu3 %vm176_vm0, %v1351_v3 }
  0x56   : > { %1047 = vmatmul.msk.f32.gmra.mxu0 %vm176_vm0, %v1351_v3 }
  0x5b   : > { %1048 = vmatmul.msk.f32.vlgmr.msra.gmra.mxu1 %vm176_vm0, %v171_v5 }
  0x5c   : > { %1037 = vmatmul.msk.f32.gmra.mxu2 %vm176_vm0, %v1351_v3  ;;  %1058 = vmatmul.msk.f32.vlgmr.msra.gmra.mxu3 %vm176_vm0, %v171_v5 }
  0x5e   : > { %1063 = vmatmul.msk.f32.vlgmr.msra.gmra.mxu0 %vm176_vm0, %v171_v5 }
  0x63   : > { %1049 = vmatmul.msk.f32.gmra.mxu1 %vm176_vm0, %v172_v1 }
  0x64   : > { %1053 = vmatmul.msk.f32.vlgmr.msra.gmra.mxu2 %vm176_vm0, %v171_v5  ;;  %1059 = vmatmul.msk.f32.gmra.mxu3 %vm176_vm0, %v172_v1 }
  0x66   : > { %1064 = vmatmul.msk.f32.gmra.mxu0 %vm176_vm0, %v172_v1 }
  0x6b   : > { %1050 = vmatmul.msk.f32.gmra.mxu1 %vm176_vm0, %v173_v2 }
  0x6c   : > { %1054 = vmatmul.msk.f32.gmra.mxu2 %vm176_vm0, %v172_v1  ;;  %1060 = vmatmul.msk.f32.gmra.mxu3 %vm176_vm0, %v173_v2 }
  0x6e   : > { %1065 = vmatmul.msk.f32.gmra.mxu0 %vm176_vm0, %v173_v2 }
  0x73   : > { %1051 = vmatmul.msk.f32.gmra.mxu1 %vm176_vm0, %v174_v9 }
  0x74   : > { %1055 = vmatmul.msk.f32.gmra.mxu2 %vm176_vm0, %v173_v2  ;;  %1061 = vmatmul.msk.f32.gmra.mxu3 %vm176_vm0, %v174_v9 }
  0x76   : > { %1066 = vmatmul.msk.f32.gmra.mxu0 %vm176_vm0, %v174_v9 }
  0x7b   : > { %1052 = vmatmul.msk.f32.gmra.mxu1 %vm176_vm0, %v1351_v3 }
  0x7c   : > { %1056 = vmatmul.msk.f32.gmra.mxu2 %vm176_vm0, %v174_v9  ;;  %1062 = vmatmul.msk.f32.gmra.mxu3 %vm176_vm0, %v1351_v3 }
  0x7e   : > { %1067 = vmatmul.msk.f32.gmra.mxu0 %vm176_vm0, %v1351_v3 }
  0x84   : > { %1057 = vmatmul.msk.f32.gmra.mxu2 %vm176_vm0, %v1351_v3 }
  0xa8   : > { %v212_v14 = vpop.f32.mrf.mxu1 }
  0xa9   : > { %550 = vrot.lane.b32.xlu0 %v212_v14, %s1232_s7  ;;  %v593_v22 = vrot.slane %v212_v14, 4 }
  0xab   : > { %v1422_v15 = vpop.f32.mrf.mxu0 }
  0xac   : > { %v489_v16 = vrot.slane %v1422_v15, 4 }
  0xaf   : > { %v215_v17 = vpop.f32.mrf.mxu2  ;;  %v1425_v18 = vpop.f32.mrf.mxu3 }
  0xb0   : > { %v1431_v21 = vpop.f32.mrf.mxu1  ;;  %v697_v28 = vrot.slane %v215_v17, 4 }
  0xb1   : > { %498 = vrot.lane.b32.xlu0 %v489_v16, %s1233_s8  ;;  %v490_v32 = vrot.slane %v1431_v21, 4 }
  0xb3   : > { %v1428_v19 = vpop.f32.mrf.mxu0 }
  0xb4   : > { %v493_v20 = vrot.slane %v1428_v19, 4 }
  0xb6   : > { %506 = vrot.lane.b32.xlu2 %v493_v20, %s1233_s8 }
  0xb7   : > { %v218_v23 = vpop.f32.mrf.mxu2  ;;  %v1434_v24 = vpop.f32.mrf.mxu3 }
  0xb8   : > { %v492_v25 = vrot.slane %v1434_v24, 4  ;;  %v244_v27 = vpop.f32.mrf.mxu1  ;;  %v801_v40 = vrot.slane %v218_v23, 4 }
  0xb9   : > { %602 = vrot.lane.b32.xlu0 %v593_v22, %s1234_s14  ;;  %v594_v34 = vrot.slane %v244_v27, 4 }
  0xba   : > { %504 = vrot.lane.b32.xlu1 %v492_v25, %s1233_s8 }
  0xbb   : > { %v340_v30 = vpop.f32.mrf.mxu0 }
  0xbc   : > { %v597_v36 = vrot.slane %v340_v30, 4 }
  0xbf   : > { %v1439_v26 = vpop.f32.mrf.mxu2  ;;  %v308_v33 = vpop.f32.mrf.mxu3 }
  0xc0   : > { %v247_v38 = vpop.f32.mrf.mxu1  ;;  %v491_v41 = vrot.slane %v1439_v26, 4  ;;  %v596_v48 = vrot.slane %v308_v33, 4 }
  0xc1   : > { %654 = vrot.lane.b32.xlu0 %v215_v17, %s1235_s16  ;;  %v698_v52 = vrot.slane %v247_v38, 4 }
  0xc2   : > { %552 = vrot.lane.b32.xlu1 %v244_v27, %s1232_s7 }
  0xc3   : > { %v343_v43 = vpop.f32.mrf.mxu0 }
  0xc4   : > { %v701_v56 = vrot.slane %v343_v43, 4 }
  0xc7   : > { %v276_v29 = vpop.f32.mrf.mxu2  ;;  %v311_v37 = vpop.f32.mrf.mxu3 }
  0xc8   : > { %554 = vrot.lane.b32.xlu2 %v276_v29, %s1232_s7  ;;  %v595_v31 = vrot.slane %v276_v29, 4  ;;  %v250_v45 = vpop.f32.mrf.mxu1  ;;  %v700_v55 = vrot.slane %v311_v37, 4 }
  0xc9   : > { %706 = vrot.lane.b32.xlu0 %v697_v28, %s1236_s17  ;;  %v802_v62 = vrot.slane %v250_v45, 4 }
  0xca   : > { %558 = vrot.lane.b32.xlu1 %v340_v30, %s1232_s7 }
  0xcb   : > { %v346_v47 = vpop.f32.mrf.mxu0 }
  0xcc   : > { %v805_v3 = vrot.slane %v346_v47, 4 }
  0xcf   : > { %v279_v35 = vpop.f32.mrf.mxu2  ;;  %v314_v42 = vpop.f32.mrf.mxu3 }
  0xd0   : > { %606 = vrot.lane.b32.xlu2 %v595_v31, %s1234_s14  ;;  %v699_v39 = vrot.slane %v279_v35, 4  ;;  %v253_v49 = vpop.f32.mrf.mxu1  ;;  %v804_v60 = vrot.slane %v314_v42, 4 }
  0xd1   : > { %500 = vrot.lane.b32.xlu0 %v490_v32, %s1233_s8 }
  0xd2   : > { %604 = vrot.lane.b32.xlu1 %v594_v34, %s1234_s14 }
  0xd3   : > { %v349_v51 = vpop.f32.mrf.mxu0 }
  0xd7   : > { %v282_v44 = vpop.f32.mrf.mxu2  ;;  %v317_v46 = vpop.f32.mrf.mxu3 }
  0xd8   : > { %658 = vrot.lane.b32.xlu2 %v279_v35, %s1235_s16  ;;  %v803_v50 = vrot.slane %v282_v44, 4  ;;  %v1465_v53 = vpop.f32.mrf.mxu1 }
  0xd9   : > { %758 = vrot.lane.b32.xlu0 %v218_v23, %s1237_s23  ;;  %v494_v54 = vrot.slane %v1465_v53, 4 }
  0xda   : > { %610 = vrot.lane.b32.xlu1 %v597_v36, %s1234_s14 }
  0xdb   : > { %v465_v57 = vpop.f32.mrf.mxu0 }
  0xdc   : > { %v497_v58 = vrot.slane %v465_v57, 4 }
  0xdf   : > { %v285_v0 = vpop.f32.mrf.mxu2  ;;  %v1496_v11 = vpop.f32.mrf.mxu3 }
  0xe0   : > { %710 = vrot.lane.b32.xlu2 %v699_v39, %s1236_s17  ;;  %v372_v59 = vpop.f32.mrf.mxu1  ;;  %v496_v16 = vrot.slane %v1496_v11, 4 }
  0xe1   : > { %810 = vrot.lane.b32.xlu0 %v801_v40, %s1238_s24  ;;  %v598_v2 = vrot.slane %v372_v59, 4 }
  0xe2   : > { %502 = vrot.lane.b32.xlu1 %v491_v41, %s1233_s8 }
  0xe3   : > { %v468_v61 = vpop.f32.mrf.mxu0 }
  0xe4   : > { %v601_v7 = vrot.slane %v468_v61, 4 }
  0xe7   : > { %v1488_v5 = vpop.f32.mrf.mxu2  ;;  %v436_v30 = vpop.f32.mrf.mxu3 }
  0xe8   : > { %762 = vrot.lane.b32.xlu2 %v282_v44, %s1237_s23  ;;  %v495_v8 = vrot.slane %v1488_v5, 4  ;;  %v375_v14 = vpop.f32.mrf.mxu1  ;;  %v600_v36 = vrot.slane %v436_v30, 4 }
  0xe9   : > { %556 = vrot.lane.b32.xlu0 %v308_v33, %s1232_s7  ;;  %v702_v33 = vrot.slane %v375_v14, 4 }
  0xea   : > { %656 = vrot.lane.b32.xlu1 %v247_v38, %s1235_s16 }
  0xeb   : > { %v471_v29 = vpop.f32.mrf.mxu0 }
  0xec   : > { %v705_v39 = vrot.slane %v471_v29, 4 }
  0xef   : > { %v404_v17 = vpop.f32.mrf.mxu2 }
  0xf0   : > { %868 = vrot.lane.b32.xlu2 %v317_v46, %s1239_s25  ;;  %v599_v25 = vrot.slane %v404_v17, 4 }
  0xf1   : > { %608 = vrot.lane.b32.xlu0 %v596_v48, %s1234_s14 }
  0xf2   : > { %662 = vrot.lane.b32.xlu1 %v343_v43, %s1235_s16 }
  0xf7   : > { %v407_v35 = vpop.f32.mrf.mxu2 }
  0xf8   : > { %814 = vrot.lane.b32.xlu2 %v803_v50, %s1238_s24 }
  0xf9   : > { %660 = vrot.lane.b32.xlu0 %v311_v37, %s1235_s16 }
  0xfa   : > { %708 = vrot.lane.b32.xlu1 %v698_v52, %s1236_s17 }
  0xff   : > { %v410_v52 = vpop.f32.mrf.mxu2 }
 0x100   : > { %508 = vrot.lane.b32.xlu2 %v494_v54, %s1233_s8 }
 0x101   : > { %712 = vrot.lane.b32.xlu0 %v700_v55, %s1236_s17 }
 0x102   : > { %714 = vrot.lane.b32.xlu1 %v701_v56, %s1236_s17 }
 0x108   : > { %514 = vrot.lane.b32.xlu2 %v497_v58, %s1233_s8  ;;  %v807_v58 = vrot.slane %v410_v52, 4 }
 0x109   : > { %764 = vrot.lane.b32.xlu0 %v314_v42, %s1237_s23  ;;  %v703_v42 = vrot.slane %v407_v35, 4 }
 0x10a   : > { %760 = vrot.lane.b32.xlu1 %v250_v45, %s1237_s23 }
 0x110   : > { %560 = vrot.lane.b32.xlu2 %v372_v59, %s1232_s7  ;;  %v1479_v63 = vpop.permute.xlu2 %506 }
 0x111   : > { %816 = vrot.lane.b32.xlu0 %v804_v60, %s1238_s24  ;;  %v474_v60 = vpop.f32.mrf.mxu0 }
 0x112   : > { %766 = vrot.lane.b32.xlu1 %v346_v47, %s1237_s23  ;;  %v439_v47 = vpop.f32.mrf.mxu3 }
 0x113   : > { %v704_v54 = vrot.slane %v439_v47, 4 }
 0x118   : > { %566 = vrot.lane.b32.xlu2 %v468_v61, %s1232_s7 }
 0x119   : > { %864 = vrot.lane.b32.xlu0 %v253_v49, %s1239_s25 }
 0x11a   : > { %812 = vrot.lane.b32.xlu1 %v802_v62, %s1238_s24  ;;  %v442_v62 = vpop.f32.mrf.mxu3 }
 0x11b   : > { %v551_v1 = vpop.permute.xlu0 %550 }
 0x120   : > { %612 = vrot.lane.b32.xlu2 %v598_v2, %s1234_s14 }
 0x121   : > { %870 = vrot.lane.b32.xlu0 %v349_v51, %s1239_s25 }
 0x122   : > { %v1485_v4 = vpop.permute.xlu2 %554  ;;  %818 = vrot.lane.b32.xlu1 %v805_v3, %s1238_s24 }
 0x123   : > { %v499_v6 = vpop.permute.xlu0 %498 }
 0x128   : > { %618 = vrot.lane.b32.xlu2 %v601_v7, %s1234_s14 }
 0x129   : > { %510 = vrot.lane.b32.xlu0 %v495_v8, %s1233_s8 }
 0x12a   : > { %v1493_v9 = vpop.permute.xlu2 %606  ;;  %866 = vrot.lane.b32.xlu1 %v285_v0, %s1239_s25 }
 0x12b   : > { %v603_v10 = vpop.permute.xlu0 %602 }
 0x12c   : > { %v1498_v12 = vpop.permute.xlu1 %504 }
 0x12d   : > { %v1503_v13 = vsel %vm516_vm1, %v1498_v12, %v1479_v63 }
 0x130   : > { %664 = vrot.lane.b32.xlu2 %v375_v14, %s1235_s16 }
 0x131   : > { %562 = vrot.lane.b32.xlu0 %v404_v17, %s1232_s7 }
 0x132   : > { %v1508_v20 = vpop.permute.xlu2 %658  ;;  %512 = vrot.lane.b32.xlu1 %v496_v16, %s1233_s8 }
 0x133   : > { %v1511_v22 = vpop.permute.xlu0 %654 }
 0x134   : > { %v553_v23 = vpop.permute.xlu1 %552 }
 0x135   : > { %v569_v27 = vsel %vm568_vm2, %v551_v1, %v553_v23  ;;  %v570_v28 = vsel %vm568_vm2, %v553_v23, %v1485_v4 }
 0x138   : > { %670 = vrot.lane.b32.xlu2 %v471_v29, %s1235_s16  ;;  %v809_v29 = vrot.slane %v474_v60, 4 }
 0x139   : > { %614 = vrot.lane.b32.xlu0 %v599_v25, %s1234_s14 }
 0x13a   : > { %v1518_v31 = vpop.permute.xlu2 %710  ;;  %564 = vrot.lane.b32.xlu1 %v436_v30, %s1232_s7 }
 0x13b   : > { %v1521_v32 = vpop.permute.xlu0 %706 }
 0x13c   : > { %v1523_v34 = vpop.permute.xlu1 %558 }
 0x140   : > { %716 = vrot.lane.b32.xlu2 %v702_v33, %s1236_s17 }
 0x141   : > { %666 = vrot.lane.b32.xlu0 %v407_v35, %s1235_s16 }
 0x142   : > { %v1527_v37 = vpop.permute.xlu2 %762  ;;  %616 = vrot.lane.b32.xlu1 %v600_v36, %s1234_s14  ;;  %s1184_s14 = scalar_lea.hbm %s1736_s2, 64 }
 0x143   : > { %v501_v38 = vpop.permute.xlu0 %500  ;;  %p1186_p4 = scmp.lt.s32.totalorder %s1184_s14, %s1180_s6 }
 0x144   : > { %v517_v40 = vsel %vm516_vm1, %v499_v6, %v501_v38  ;;  %v605_v41 = vpop.permute.xlu1 %604  ;;  %v536_v6 = vadd.f32 %v1503_v13, %v1434_v24 }
 0x145   : > { %v533_v43 = vadd.f32 %v517_v40, %v1422_v15  ;;  %v621_v44 = vsel %vm620_vm3, %v603_v10, %v605_v41  ;;  %v622_v45 = vsel %vm620_vm3, %v605_v41, %v1493_v9  ;;  %v378_v15 = vpop.f32.mrf.mxu1  ;;  %p1187_p5 = por %p1186_p4, %p1185_p3 }
 0x146   : > { %v806_v8 = vrot.slane %v378_v15, 4 }
 0x147   : > { %v585_v46 = vadd.f32 %v569_v27, %v533_v43  ;;  %v808_v27 = vrot.slane %v442_v62, 4  ;;  %p1188_p7 = pnand %p1187_p5, %p1183_p2 }
 0x148   : > { %722 = vrot.lane.b32.xlu2 %v705_v39, %s1236_s17 }
 0x149   : > { %v637_v48 = vadd.f32 %v621_v44, %v585_v46  ;;  %718 = vrot.lane.b32.xlu0 %v703_v42, %s1236_s17 }
 0x14a   : > { %v1537_v49 = vpop.permute.xlu2 %868  ;;  %668 = vrot.lane.b32.xlu1 %v439_v47, %s1235_s16  ;;  %v413_v47 = vpop.f32.mrf.mxu2 }
 0x14b   : > { %v1540_v50 = vpop.permute.xlu0 %758 }
 0x14c   : > { %v1542_v51 = vpop.permute.xlu1 %610 }
 0x14d   : > { %v381_v39 = vpop.f32.mrf.mxu1 }
 0x150   : > { %768 = vrot.lane.b32.xlu2 %v378_v15, %s1237_s23 }
 0x151   : > { %770 = vrot.lane.b32.xlu0 %v410_v52, %s1237_s23  ;;  %v477_v52 = vpop.f32.mrf.mxu0 }
 0x152   : > { %v1546_v55 = vpop.permute.xlu2 %814  ;;  %720 = vrot.lane.b32.xlu1 %v704_v54, %s1236_s17 }
 0x153   : > { %v1549_v56 = vpop.permute.xlu0 %810 }
 0x154   : > { %v503_v57 = vpop.permute.xlu1 %502 }
 0x155   : > { %v518_v59 = vsel %vm516_vm1, %v501_v38, %v503_v57  ;;  %v519_v0 = vsel %vm516_vm1, %v503_v57, %v1498_v12 }
 0x156   : > { %v534_v61 = vadd.f32 %v518_v59, %v1431_v21  ;;  %v535_v21 = vadd.f32 %v519_v0, %v1439_v26  ;;  %v445_v26 = vpop.f32.mrf.mxu3 }
 0x158   : > { %v586_v1 = vadd.f32 %v570_v28, %v534_v61  ;;  %774 = vrot.lane.b32.xlu2 %v474_v60, %s1237_s23 }
 0x159   : > { %822 = vrot.lane.b32.xlu0 %v807_v58, %s1238_s24 }
 0x15a   : > { %v1557_v2 = vpop.permute.xlu2 %508  ;;  %772 = vrot.lane.b32.xlu1 %v442_v62, %s1237_s23  ;;  %v638_v3 = vadd.f32 %v622_v45, %v586_v1 }
 0x15b   : > { %v557_v7 = vpop.permute.xlu0 %556  ;;  %v521_v38 = vsel %vm516_vm1, %v1479_v63, %v1557_v2 }
 0x15c   : > { %v571_v10 = vsel %vm568_vm2, %v1485_v4, %v557_v7  ;;  %v572_v12 = vsel %vm568_vm2, %v557_v7, %v1523_v34  ;;  %v657_v14 = vpop.permute.xlu1 %656  ;;  %v537_v40 = vadd.f32 %v521_v38, %v1428_v19 }
 0x15d   : > { %v587_v16 = vadd.f32 %v571_v10, %v535_v21  ;;  %v588_v17 = vadd.f32 %v572_v12, %v536_v6  ;;  %v673_v23 = vsel %vm672_vm4, %v1511_v22, %v657_v14  ;;  %v674_v25 = vsel %vm672_vm4, %v657_v14, %v1508_v20 }
 0x15e   : > { %v689_v24 = vadd.f32 %v673_v23, %v637_v48  ;;  %v690_v13 = vadd.f32 %v674_v25, %v638_v3 }
 0x160   : > { %820 = vrot.lane.b32.xlu2 %v806_v8, %s1238_s24 }
 0x161   : > { %876 = vrot.lane.b32.xlu0 %v445_v26, %s1239_s25 }
 0x162   : > { %824 = vrot.lane.b32.xlu1 %v808_v27, %s1238_s24  ;;  %v1574_v4 = vpop.permute.xlu2 %514 }
 0x163   : > { %v609_v28 = vpop.permute.xlu0 %608 }
 0x164   : > { %v623_v22 = vsel %vm620_vm3, %v1493_v9, %v609_v28  ;;  %v624_v30 = vsel %vm620_vm3, %v609_v28, %v1542_v51  ;;  %v663_v33 = vpop.permute.xlu1 %662 }
 0x165   : > { %v639_v35 = vadd.f32 %v623_v22, %v587_v16  ;;  %v640_v36 = vadd.f32 %v624_v30, %v588_v17 }
 0x168   : > { %826 = vrot.lane.b32.xlu2 %v809_v29, %s1238_s24 }
 0x16a   : > { %872 = vrot.lane.b32.xlu1 %v381_v39, %s1239_s25  ;;  %v1586_v41 = vpop.permute.xlu2 %560 }
 0x16b   : > { %v573_v9 = vsel %vm568_vm2, %v1523_v34, %v1586_v41  ;;  %v661_v42 = vpop.permute.xlu0 %660 }
 0x16c   : > { %v589_v43 = vadd.f32 %v573_v9, %v537_v40  ;;  %v675_v44 = vsel %vm672_vm4, %v1508_v20, %v661_v42  ;;  %v709_v63 = vpop.permute.xlu1 %708 }
 0x16d   : > { %v691_v45 = vadd.f32 %v675_v44, %v639_v35  ;;  %v725_v46 = vsel %vm724_vm5, %v1521_v32, %v709_v63  ;;  %v726_v19 = vsel %vm724_vm5, %v709_v63, %v1518_v31 }
 0x16e   : > { %v741_v48 = vadd.f32 %v725_v46, %v689_v24  ;;  %v742_v15 = vadd.f32 %v726_v19, %v690_v13 }
 0x170   : > { %874 = vrot.lane.b32.xlu2 %v413_v47, %s1239_s25 }
 0x172   : > { %v1598_v34 = vpop.permute.xlu2 %566  ;;  %878 = vrot.lane.b32.xlu1 %v477_v52, %s1239_s25 }
 0x173   : > { %v713_v54 = vpop.permute.xlu0 %712 }
 0x174   : > { %v727_v20 = vsel %vm724_vm5, %v1518_v31, %v713_v54  ;;  %v715_v57 = vpop.permute.xlu1 %714 }
 0x175   : > { %v743_v58 = vadd.f32 %v727_v20, %v691_v45  ;;  %v728_v26 = vsel %vm724_vm5, %v713_v54, %v715_v57 }
 0x178   : > { %862 = vrot.lane.b32.xlu2 %v1425_v18, %s1239_s25 }
 0x17a   : > { %v1605_v32 = vpop.permute.xlu2 %612 }
 0x17b   : > { %v625_v59 = vsel %vm620_vm3, %v1542_v51, %v1605_v32  ;;  %v765_v60 = vpop.permute.xlu0 %764 }
 0x17c   : > { %v641_v61 = vadd.f32 %v625_v59, %v589_v43  ;;  %v779_v62 = vsel %vm776_vm6, %v1527_v37, %v765_v60  ;;  %v761_v0 = vpop.permute.xlu1 %760 }
 0x17d   : > { %v795_v1 = vadd.f32 %v779_v62, %v743_v58  ;;  %v777_v31 = vsel %vm776_vm6, %v1540_v50, %v761_v0  ;;  %v778_v18 = vsel %vm776_vm6, %v761_v0, %v1527_v37  ;;  %v676_v37 = vsel %vm672_vm4, %v661_v42, %v663_v33 }
 0x17e   : > { %v793_v3 = vadd.f32 %v777_v31, %v741_v48  ;;  %v794_v6 = vadd.f32 %v778_v18, %v742_v15  ;;  %v692_v27 = vadd.f32 %v676_v37, %v640_v36 }
 0x180   : > { %v744_v29 = vadd.f32 %v728_v26, %v692_v27 }
 0x182   : > { %v1616_v21 = vpop.permute.xlu2 %618 }
 0x183   : > { %v817_v7 = vpop.permute.xlu0 %816 }
 0x184   : > { %v831_v51 = vsel %vm828_vm7, %v1546_v55, %v817_v7  ;;  %v767_v8 = vpop.permute.xlu1 %766 }
 0x185   : > { %v847_v10 = vadd.f32 %v831_v51, %v795_v1  ;;  %v780_v28 = vsel %vm776_vm6, %v765_v60, %v767_v8 }
 0x18a   : > { %v665_v12 = vpop.permute.xlu2 %664 }
 0x18b   : > { %v677_v14 = vsel %vm672_vm4, %v663_v33, %v665_v12  ;;  %v1621_v16 = vpop.permute.xlu0 %864  ;;  %v796_v33 = vadd.f32 %v780_v28, %v744_v29 }
 0x18c   : > { %v693_v50 = vadd.f32 %v677_v14, %v641_v61  ;;  %v813_v17 = vpop.permute.xlu1 %812 }
 0x18d   : > { %v829_v23 = vsel %vm828_vm7, %v1549_v56, %v813_v17  ;;  %v830_v25 = vsel %vm828_vm7, %v813_v17, %v1546_v55 }
 0x18e   : > { %v1628_v24 = vadd.f32 %v829_v23, %v793_v3  ;;  %v1630_v13 = vadd.f32 %v830_v25, %v794_v6 }
 0x192   : > { %v671_v22 = vpop.permute.xlu2 %670 }
 0x193   : > { %v1634_v30 = vpop.permute.xlu0 %870 }
 0x194   : > { %v819_v35 = vpop.permute.xlu1 %818  ;;  %v884_v55 = vsel %vm880_vm8, %v1537_v49, %v1634_v30 }
 0x195   : > { %v832_v56 = vsel %vm828_vm7, %v817_v7, %v819_v35 }
 0x196   : > { %v848_v38 = vadd.f32 %v832_v56, %v796_v33 }
 0x198   : > { %v900_v39 = vadd.f32 %v884_v55, %v848_v38 }
 0x19a   : > { %v717_v40 = vpop.permute.xlu2 %716  ;;  %v914_v63 = vrot.slane %v900_v39, 4 }
 0x19b   : > { %v729_v36 = vsel %vm724_vm5, %v715_v57, %v717_v40  ;;  %v511_v9 = vpop.permute.xlu0 %510 }
 0x19c   : > { %v745_v42 = vadd.f32 %v729_v36, %v693_v50  ;;  %v867_v43 = vpop.permute.xlu1 %866  ;;  %v522_v15 = vsel %vm516_vm1, %v1557_v2, %v511_v9 }
 0x19d   : > { %v883_v44 = vsel %vm880_vm8, %v867_v43, %v1537_v49  ;;  %v538_v49 = vadd.f32 %v522_v15, %v1465_v53 }
 0x19e   : > { %v899_v45 = vadd.f32 %v883_v44, %v847_v10 }
 0x1a0   : > { %v919_v46 = vsel %vm917_vm9, %v899_v45, %v914_v63 }
 0x1a1   : > { %927 = vst [vmem:[%s1645_s27 + $0x8] sm:$0xff] %v919_v46 }
 0x1a2   : > { %v1648_v19 = vpop.permute.xlu2 %722 }
 0x1a3   : > { %v563_v47 = vpop.permute.xlu0 %562 }
 0x1a4   : > { %v513_v48 = vpop.permute.xlu1 %512  ;;  %v574_v52 = vsel %vm568_vm2, %v1586_v41, %v563_v47 }
 0x1a5   : > { %v524_v54 = vsel %vm516_vm1, %v513_v48, %v1574_v4  ;;  %v590_v57 = vadd.f32 %v574_v52, %v538_v49  ;;  %v523_v33 = vsel %vm516_vm1, %v511_v9, %v513_v48 }
 0x1a6   : > { %v540_v60 = vadd.f32 %v524_v54, %v1496_v11 }
 0x1aa   : > { %v769_v20 = vpop.permute.xlu2 %768 }
 0x1ab   : > { %v781_v58 = vsel %vm776_vm6, %v767_v8, %v769_v20  ;;  %v615_v59 = vpop.permute.xlu0 %614 }
 0x1ac   : > { %v797_v61 = vadd.f32 %v781_v58, %v745_v42  ;;  %v565_v62 = vpop.permute.xlu1 %564  ;;  %v626_v2 = vsel %vm620_vm3, %v1605_v32, %v615_v59 }
 0x1ad   : > { %v576_v41 = vsel %vm568_vm2, %v565_v62, %v1598_v34  ;;  %v642_v0 = vadd.f32 %v626_v2, %v590_v57  ;;  %v575_v55 = vsel %vm568_vm2, %v563_v47, %v565_v62 }
 0x1ae   : > { %v592_v53 = vadd.f32 %v576_v41, %v540_v60 }
 0x1b2   : > { %v775_v1 = vpop.permute.xlu2 %774 }
 0x1b3   : > { %v667_v31 = vpop.permute.xlu0 %666 }
 0x1b4   : > { %v617_v4 = vpop.permute.xlu1 %616  ;;  %v678_v18 = vsel %vm672_vm4, %v665_v12, %v667_v31 }
 0x1b5   : > { %v628_v3 = vsel %vm620_vm3, %v617_v4, %v1616_v21  ;;  %v694_v6 = vadd.f32 %v678_v18, %v642_v0  ;;  %v882_v21 = vsel %vm880_vm8, %v1621_v16, %v867_v43 }
 0x1b6   : > { %v644_v11 = vadd.f32 %v628_v3, %v592_v53  ;;  %v898_v25 = vadd.f32 %v882_v21, %v1630_v13  ;;  %v539_v13 = vadd.f32 %v523_v33, %v1488_v5 }
 0x1b8   : > { %v913_v28 = vrot.slane %v898_v25, 4  ;;  %v591_v42 = vadd.f32 %v575_v55, %v539_v13 }
 0x1ba   : > { %v821_v7 = vpop.permute.xlu2 %820 }
 0x1bb   : > { %v833_v51 = vsel %vm828_vm7, %v819_v35, %v821_v7  ;;  %v719_v14 = vpop.permute.xlu0 %718 }
 0x1bc   : > { %v849_v8 = vadd.f32 %v833_v51, %v797_v61  ;;  %v669_v32 = vpop.permute.xlu1 %668  ;;  %v730_v35 = vsel %vm724_vm5, %v717_v40, %v719_v14 }
 0x1bd   : > { %v680_v10 = vsel %vm672_vm4, %v669_v32, %v671_v22  ;;  %v746_v36 = vadd.f32 %v730_v35, %v694_v6  ;;  %v679_v9 = vsel %vm672_vm4, %v667_v31, %v669_v32 }
 0x1be   : > { %v696_v34 = vadd.f32 %v680_v10, %v644_v11 }
 0x1c2   : > { %v827_v50 = vpop.permute.xlu2 %826 }
 0x1c3   : > { %v771_v23 = vpop.permute.xlu0 %770 }
 0x1c4   : > { %v721_v17 = vpop.permute.xlu1 %720  ;;  %v782_v39 = vsel %vm776_vm6, %v769_v20, %v771_v23 }
 0x1c5   : > { %v798_v43 = vadd.f32 %v782_v39, %v746_v36  ;;  %v731_v45 = vsel %vm724_vm5, %v719_v14, %v721_v17  ;;  %v732_v46 = vsel %vm724_vm5, %v721_v17, %v1648_v19 }
 0x1c6   : > { %v748_v20 = vadd.f32 %v732_v46, %v696_v34 }
 0x1ca   : > { %v875_v37 = vpop.permute.xlu2 %874 }
 0x1cb   : > { %v823_v56 = vpop.permute.xlu0 %822 }
 0x1cc   : > { %v773_v12 = vpop.permute.xlu1 %772 }
 0x1cd   : > { %v783_v52 = vsel %vm776_vm6, %v771_v23, %v773_v12  ;;  %v784_v49 = vsel %vm776_vm6, %v773_v12, %v775_v1 }
 0x1ce   : > { %v800_v60 = vadd.f32 %v784_v49, %v748_v20 }
 0x1d2   : > { %v863_v26 = vpop.permute.xlu2 %862 }
 0x1d3   : > { %v881_v27 = vsel %vm880_vm8, %v863_v26, %v1621_v16  ;;  %v627_v16 = vsel %vm620_vm3, %v615_v59, %v617_v4  ;;  %v877_v61 = vpop.permute.xlu0 %876 }
 0x1d4   : > { %v897_v29 = vadd.f32 %v881_v27, %v1628_v24  ;;  %v825_v22 = vpop.permute.xlu1 %824  ;;  %v834_v24 = vsel %vm828_vm7, %v821_v7, %v823_v56  ;;  %v643_v40 = vadd.f32 %v627_v16, %v591_v42  ;;  %v887_v53 = vsel %vm880_vm8, %v875_v37, %v877_v61 }
 0x1d5   : > { %v850_v44 = vadd.f32 %v834_v24, %v798_v43  ;;  %v835_v19 = vsel %vm828_vm7, %v823_v56, %v825_v22  ;;  %v836_v59 = vsel %vm828_vm7, %v825_v22, %v827_v50 }
 0x1d6   : > { %v918_v38 = vsel %vm917_vm9, %v897_v29, %v913_v28  ;;  %v695_v48 = vadd.f32 %v679_v9, %v643_v40  ;;  %v852_v41 = vadd.f32 %v836_v59, %v800_v60 }
 0x1d7   : > { %926 = vst [vmem:[%s1645_s27] sm:$0xff] %v918_v38 }
 0x1d8   : > { %v747_v54 = vadd.f32 %v731_v45, %v695_v48 }
 0x1dc   : > { %v873_v63 = vpop.permute.xlu1 %872 }
 0x1dd   : > { %v885_v5 = vsel %vm880_vm8, %v1634_v30, %v873_v63  ;;  %v886_v47 = vsel %vm880_vm8, %v873_v63, %v875_v37  ;;  %v799_v30 = vadd.f32 %v783_v52, %v747_v54 }
 0x1de   : > { %v902_v15 = vadd.f32 %v886_v47, %v850_v44  ;;  %v901_v57 = vadd.f32 %v885_v5, %v849_v8 }
 0x1df   : > { %v851_v2 = vadd.f32 %v835_v19, %v799_v30 }
 0x1e0   : > { %v915_v58 = vrot.slane %v902_v15, 4 }
 0x1e1   : > { %v903_v4 = vadd.f32 %v887_v53, %v851_v2 }
 0x1e2   : > { %v920_v62 = vsel %vm917_vm9, %v901_v57, %v915_v58 }
 0x1e3   : > { %928 = vst [vmem:[%s1645_s27 + $0x10] sm:$0xff] %v920_v62 }
 0x1e4   : > { %v879_v0 = vpop.permute.xlu1 %878 }
 0x1e5   : > { %v888_v1 = vsel %vm880_vm8, %v877_v61, %v879_v0 }
 0x1e6   : > { %v904_v31 = vadd.f32 %v888_v1, %v852_v41 }
 0x1e8   : > { %v916_v18 = vrot.slane %v904_v31, 4 }
 0x1ea   : > { %v921_v3 = vsel %vm917_vm9, %v903_v4, %v916_v18 }
 0x1eb   : > { %929 = vst [vmem:[%s1645_s27 + $0x18] sm:$0xff] %v921_v3 }
 0x1ec   : > { %1191 = shalt.err (!%p1188_p7)
}
 0x1ed   : > { %1082 = dma.vmem_to_hbm [thread:$0]  (%p1301_p11), %s945_s13, 512, %s947_s3, %s931_s4  }
 0x1ee PF: > { %s958_s22 = sand.u32 1, %s1218_s9   ;;  %p1089_p8 = pnand %p1019_p9, %p1305_p12 }
 0x1ef   : > { %s959_s23 = scalar_lea.sflag [#allocation4], %s958_s22 }
 0x1f0   : > { %p1090_p10 = pneg %p1089_p8 }
 0x1f2   : > { %1213 = dma.done.wait (%p1090_p10), %s959_s23, 512  }
 0x1f3   : > { %1215 = vsyncadd (%p1090_p10), %s959_s23, 4294966784  ;;  %p15_p0 = scmp.ge.s32.totalorder %s1280_s15, 4   ;;  %s1741_s9 = smov %s1222_s10 }
 0x1f4   : > { %s1742_s10 = smov %s1226_s11  ;;  %s1743_s11 = smov %s1292_s18 }
 0x1f5   : > { %s1744_s12 = smov %s1280_s15  ;;  %17 = sbr.rel (!%p15_p0) target bundleno = 5 (0x5), region = 73 }
 0x1fa   :  { %965 = vsyncpa [#allocation3], 1 }
 0x1fb   :  { %967 = vsyncpa [#allocation3 + $0x1], 1 }
 0x1fc   :  { %968 = vsyncpa [#allocation4], 1 }
 0x1fd   :  { %970 = vsyncpa [#allocation4 + $0x1], 1 }

</bundles_post_ra>
